<compile_context>
chip_gen: v5e
topology: v5e:2x2
jax: 0.10.0
libtpu: 0.0.40
codegen_flags: <defaults>
</compile_context>

<pallas_src>
import functools

import jax
import jax.numpy as jnp
from jax.experimental import pallas as pl
from jax.experimental.pallas import tpu as pltpu


def channel_attention_kernel(x_ref, w1t_ref, w2_ref, o_ref,
                             sum_acc, max_acc, *, inv_hw):
    # x_ref   : VMEM (1, C, TS)  spatial tile of one batch element (NC(HW) view)
    # w1t_ref : VMEM (C, Ch)     W1^T  (first 1x1 conv, C -> Ch)
    # w2_ref  : VMEM (C, Ch)     W2    (second 1x1 conv, Ch -> C)
    # o_ref   : VMEM (1, C, 1)   per-image attention logits -> sigmoid
    # sum_acc : VMEM (C, 1) f32  running spatial sum   (persists across s steps)
    # max_acc : VMEM (C, 1) f32  running spatial max
    s = pl.program_id(1)

    x = x_ref[0].astype(jnp.float32)                  # (C, TS)
    part_sum = jnp.sum(x, axis=1, keepdims=True)      # (C, 1)
    part_max = jnp.max(x, axis=1, keepdims=True)      # (C, 1)

    @pl.when(s == 0)
    def _():
        sum_acc[...] = part_sum
        max_acc[...] = part_max

    @pl.when(s != 0)
    def _():
        sum_acc[...] = sum_acc[...] + part_sum
        max_acc[...] = jnp.maximum(max_acc[...], part_max)

    @pl.when(s == pl.num_programs(1) - 1)
    def _():
        avg_col = sum_acc[...] * inv_hw               # (C, 1) spatial mean
        max_col = max_acc[...]                        # (C, 1) spatial max
        w1t = w1t_ref[...]                            # (C, Ch)
        w2 = w2_ref[...]                              # (C, Ch)

        def shared_mlp(col):
            # layer 1:  h[j] = sum_c W1[j, c] * v[c]      -> (1, Ch)
            h = jnp.sum(w1t * col, axis=0, keepdims=True)
            h = jnp.maximum(h, 0.0)                       # ReLU
            # layer 2:  o[c] = sum_j W2[c, j] * h[j]      -> (C, 1)
            return jnp.sum(w2 * h, axis=1, keepdims=True)

        logits = shared_mlp(avg_col) + shared_mlp(max_col)
        o_ref[0] = jax.nn.sigmoid(logits).astype(o_ref.dtype)


def channel_attention(x, w1, w2, *, spatial_tile=None):
    """ChannelAttention forward.

    x  : (N, C, H, W)
    w1 : (C//16, C) or (C//16, C, 1, 1)  -- fc[0] weight (no bias)
    w2 : (C, C//16) or (C, C//16, 1, 1)  -- fc[2] weight (no bias)
    returns (N, C, 1, 1) sigmoid attention map.
    """
    N, C, H, W = x.shape
    HW = H * W
    w1 = jnp.reshape(w1, (-1, C))          # (Ch, C)
    Ch = w1.shape[0]
    w2 = jnp.reshape(w2, (C, Ch))          # (C, Ch)

    # Lane-dense spatial tile: multiple of 128 when possible, else full H*W.
    if spatial_tile is None:
        spatial_tile = HW
        for t in (2048, 1024, 512, 256, 128):
            if HW % t == 0:
                spatial_tile = t
                break
    assert HW % spatial_tile == 0, "spatial_tile must divide H*W"
    num_s = HW // spatial_tile

    x2 = jnp.reshape(x, (N, C, HW))                    # free reshape, lane-dense
    w1t = jnp.transpose(w1).astype(jnp.float32)        # (C, Ch)
    w2f = w2.astype(jnp.float32)                       # (C, Ch)

    kernel = functools.partial(channel_attention_kernel, inv_hw=1.0 / HW)
    out = pl.pallas_call(
        kernel,
        out_shape=jax.ShapeDtypeStruct((N, C, 1), x.dtype),
        grid=(N, num_s),
        in_specs=[
            pl.BlockSpec((1, C, spatial_tile), lambda n, s: (n, 0, s)),  # x
            pl.BlockSpec((C, Ch), lambda n, s: (0, 0)),                  # W1^T
            pl.BlockSpec((C, Ch), lambda n, s: (0, 0)),                  # W2
        ],
        out_specs=pl.BlockSpec((1, C, 1), lambda n, s: (n, 0, 0)),
        scratch_shapes=[
            pltpu.VMEM((C, 1), jnp.float32),   # running sum
            pltpu.VMEM((C, 1), jnp.float32),   # running max
        ],
        compiler_params=pltpu.CompilerParams(
            # batch axis independent -> parallel (v7x megacore); reduction last.
            dimension_semantics=("parallel", "arbitrary"),
            vmem_limit_bytes=32 * 1024 * 1024,
        ),
    )(x2, w1t, w2f)
    return jnp.reshape(out, (N, C, 1, 1))


def reference(x, w1, w2):
    N, C, H, W = x.shape
    w1 = jnp.reshape(w1, (-1, C))
    w2 = jnp.reshape(w2, (C, -1))
    avg = jnp.mean(x, axis=(2, 3))      # (N, C)
    mx = jnp.max(x, axis=(2, 3))        # (N, C)

    def fc(v):
        h = jnp.maximum(v @ w1.T, 0.0)  # (N, Ch)
        return h @ w2.T                 # (N, C)

    out = jax.nn.sigmoid(fc(avg) + fc(mx))
    return jnp.reshape(out, (N, C, 1, 1))


if __name__ == "__main__":
    key = jax.random.PRNGKey(0)
    kx, k1, k2 = jax.random.split(key, 3)

    # in_planes must be >= 16 for the C//16 bottleneck of the PyTorch module.
    N, C, H, W = 2, 64, 16, 16
    Ch = C // 16
    x = jax.random.normal(kx, (N, C, H, W), dtype=jnp.float32)
    w1 = jax.random.normal(k1, (Ch, C), dtype=jnp.float32) * (1.0 / C ** 0.5)
    w2 = jax.random.normal(k2, (C, Ch), dtype=jnp.float32) * (1.0 / Ch ** 0.5)

    # spatial_tile=128 -> two reduction steps, exercising the accumulator path.
    out = channel_attention(x, w1, w2, spatial_tile=128)
    out = jax.block_until_ready(out)

    ref = reference(x, w1, w2)
    assert out.shape == (N, C, 1, 1)
    assert jnp.allclose(out, ref, atol=1e-5, rtol=1e-5), (
        f"max err {jnp.max(jnp.abs(out - ref))}")
    print("KERNEL_OK")
</pallas_src>

<mosaic_0001>
module attributes {stable_mosaic.version = 11 : i64} {
  func.func @channel_attention_kernel(%arg0: i32, %arg1: i32, %arg2: memref<1x64x128xf32, #tpu.memory_space<vmem>>, %arg3: memref<64x4xf32, #tpu.memory_space<vmem>>, %arg4: memref<64x4xf32, #tpu.memory_space<vmem>>, %arg5: memref<1x64x1xf32, #tpu.memory_space<vmem>>, %arg6: memref<64x1xf32, #tpu.memory_space<vmem>>, %arg7: memref<64x1xf32, #tpu.memory_space<vmem>>) attributes {dimension_semantics = [#tpu.dimension_semantics<parallel>, #tpu.dimension_semantics<arbitrary>], iteration_bounds = array<i64: 2, 2>, scalar_prefetch = 0 : i64, scratch_operands = 2 : i64, tpu.core_type = #tpu.core_type<tc>, window_params = [{transform_indices = @transform_0, window_bounds = array<i64: 1, 64, 128>}, {pipeline_mode = #tpu.pipeline_mode<synchronous>, transform_indices = @transform_1, window_bounds = array<i64: 64, 4>}, {pipeline_mode = #tpu.pipeline_mode<synchronous>, transform_indices = @transform_2, window_bounds = array<i64: 64, 4>}, {transform_indices = @transform_3, window_bounds = array<i64: 1, 64, 1>}]} {
    %c0 = arith.constant 0 : index
    %c0_0 = arith.constant 0 : index
    %c0_1 = arith.constant 0 : index
    %0 = vector.load %arg2[%c0, %c0_0, %c0_1] : memref<1x64x128xf32, #tpu.memory_space<vmem>>, vector<1x64x128xf32>
    %1 = vector.shape_cast %0 : vector<1x64x128xf32> to vector<64x128xf32>
    %cst = arith.constant dense<0.000000e+00> : vector<64xf32>
    %2 = vector.multi_reduction <add>, %1, %cst [1] : vector<64x128xf32> to vector<64xf32>
    %3 = vector.shape_cast %2 : vector<64xf32> to vector<64x1xf32>
    %cst_2 = arith.constant dense<0xFF800000> : vector<64xf32>
    %4 = vector.multi_reduction <maximumf>, %1, %cst_2 [1] : vector<64x128xf32> to vector<64xf32>
    %5 = vector.shape_cast %4 : vector<64xf32> to vector<64x1xf32>
    %c0_i32 = arith.constant 0 : i32
    %6 = arith.cmpi eq, %arg1, %c0_i32 : i32
    %7 = arith.extui %6 : i1 to i32
    %c0_i32_3 = arith.constant 0 : i32
    %8 = arith.cmpi ne, %7, %c0_i32_3 : i32
    scf.if %8 {
      %c0_7 = arith.constant 0 : index
      %c0_8 = arith.constant 0 : index
      %15 = vector.load %arg6[%c0_7, %c0_8] : memref<64x1xf32, #tpu.memory_space<vmem>>, vector<64x1xf32>
      tpu.vector_store %arg6[%c0_7, %c0_8], %3 {strides = array<i32>} : memref<64x1xf32, #tpu.memory_space<vmem>>, vector<64x1xf32>,
      %c0_9 = arith.constant 0 : index
      %c0_10 = arith.constant 0 : index
      %16 = vector.load %arg7[%c0_9, %c0_10] : memref<64x1xf32, #tpu.memory_space<vmem>>, vector<64x1xf32>
      tpu.vector_store %arg7[%c0_9, %c0_10], %5 {strides = array<i32>} : memref<64x1xf32, #tpu.memory_space<vmem>>, vector<64x1xf32>,
    } else {
    }
    %c0_i32_4 = arith.constant 0 : i32
    %9 = arith.cmpi ne, %arg1, %c0_i32_4 : i32
    %10 = arith.extui %9 : i1 to i32
    %c0_i32_5 = arith.constant 0 : i32
    %11 = arith.cmpi ne, %10, %c0_i32_5 : i32
    scf.if %11 {
      %c0_7 = arith.constant 0 : index
      %c0_8 = arith.constant 0 : index
      %15 = vector.load %arg6[%c0_7, %c0_8] : memref<64x1xf32, #tpu.memory_space<vmem>>, vector<64x1xf32>
      %16 = arith.addf %15, %3 : vector<64x1xf32>
      %c0_9 = arith.constant 0 : index
      %c0_10 = arith.constant 0 : index
      %17 = vector.load %arg6[%c0_9, %c0_10] : memref<64x1xf32, #tpu.memory_space<vmem>>, vector<64x1xf32>
      tpu.vector_store %arg6[%c0_9, %c0_10], %16 {strides = array<i32>} : memref<64x1xf32, #tpu.memory_space<vmem>>, vector<64x1xf32>,
      %c0_11 = arith.constant 0 : index
      %c0_12 = arith.constant 0 : index
      %18 = vector.load %arg7[%c0_11, %c0_12] : memref<64x1xf32, #tpu.memory_space<vmem>>, vector<64x1xf32>
      %19 = arith.maximumf %18, %5 : vector<64x1xf32>
      %c0_13 = arith.constant 0 : index
      %c0_14 = arith.constant 0 : index
      %20 = vector.load %arg7[%c0_13, %c0_14] : memref<64x1xf32, #tpu.memory_space<vmem>>, vector<64x1xf32>
      tpu.vector_store %arg7[%c0_13, %c0_14], %19 {strides = array<i32>} : memref<64x1xf32, #tpu.memory_space<vmem>>, vector<64x1xf32>,
    } else {
    }
    %c1_i32 = arith.constant 1 : i32
    %12 = arith.cmpi eq, %arg1, %c1_i32 : i32
    %13 = arith.extui %12 : i1 to i32
    %c0_i32_6 = arith.constant 0 : i32
    %14 = arith.cmpi ne, %13, %c0_i32_6 : i32
    scf.if %14 {
      %c0_7 = arith.constant 0 : index
      %c0_8 = arith.constant 0 : index
      %15 = vector.load %arg6[%c0_7, %c0_8] : memref<64x1xf32, #tpu.memory_space<vmem>>, vector<64x1xf32>
      %cst_9 = arith.constant 3.906250e-03 : f32
      %16 = vector.broadcast %cst_9 : f32 to vector<64x1xf32>
      %17 = arith.mulf %15, %16 : vector<64x1xf32>
      %c0_10 = arith.constant 0 : index
      %c0_11 = arith.constant 0 : index
      %18 = vector.load %arg7[%c0_10, %c0_11] : memref<64x1xf32, #tpu.memory_space<vmem>>, vector<64x1xf32>
      %c0_12 = arith.constant 0 : index
      %c0_13 = arith.constant 0 : index
      %19 = vector.load %arg3[%c0_12, %c0_13] : memref<64x4xf32, #tpu.memory_space<vmem>>, vector<64x4xf32>
      %c0_14 = arith.constant 0 : index
      %c0_15 = arith.constant 0 : index
      %20 = vector.load %arg4[%c0_14, %c0_15] : memref<64x4xf32, #tpu.memory_space<vmem>>, vector<64x4xf32>
      %21 = vector.broadcast %17 : vector<64x1xf32> to vector<64x4xf32>
      %22 = arith.mulf %19, %21 : vector<64x4xf32>
      %cst_16 = arith.constant dense<0.000000e+00> : vector<4xf32>
      %23 = vector.multi_reduction <add>, %22, %cst_16 [0] : vector<64x4xf32> to vector<4xf32>
      %24 = vector.shape_cast %23 : vector<4xf32> to vector<1x4xf32>
      %cst_17 = arith.constant 0.000000e+00 : f32
      %25 = vector.broadcast %cst_17 : f32 to vector<1x4xf32>
      %26 = arith.maximumf %24, %25 : vector<1x4xf32>
      %27 = vector.broadcast %26 : vector<1x4xf32> to vector<64x4xf32>
      %28 = arith.mulf %20, %27 : vector<64x4xf32>
      %cst_18 = arith.constant dense<0.000000e+00> : vector<64xf32>
      %29 = vector.multi_reduction <add>, %28, %cst_18 [1] : vector<64x4xf32> to vector<64xf32>
      %30 = vector.shape_cast %29 : vector<64xf32> to vector<64x1xf32>
      %31 = vector.broadcast %18 : vector<64x1xf32> to vector<64x4xf32>
      %32 = arith.mulf %19, %31 : vector<64x4xf32>
      %cst_19 = arith.constant dense<0.000000e+00> : vector<4xf32>
      %33 = vector.multi_reduction <add>, %32, %cst_19 [0] : vector<64x4xf32> to vector<4xf32>
      %34 = vector.shape_cast %33 : vector<4xf32> to vector<1x4xf32>
      %cst_20 = arith.constant 0.000000e+00 : f32
      %35 = vector.broadcast %cst_20 : f32 to vector<1x4xf32>
      %36 = arith.maximumf %34, %35 : vector<1x4xf32>
      %37 = vector.broadcast %36 : vector<1x4xf32> to vector<64x4xf32>
      %38 = arith.mulf %20, %37 : vector<64x4xf32>
      %cst_21 = arith.constant dense<0.000000e+00> : vector<64xf32>
      %39 = vector.multi_reduction <add>, %38, %cst_21 [1] : vector<64x4xf32> to vector<64xf32>
      %40 = vector.shape_cast %39 : vector<64xf32> to vector<64x1xf32>
      %41 = arith.addf %30, %40 : vector<64x1xf32>
      %42 = arith.negf %41 : vector<64x1xf32>
      %43 = math.exp %42 : vector<64x1xf32>
      %cst_22 = arith.constant 1.000000e+00 : f32
      %44 = vector.broadcast %cst_22 : f32 to vector<64x1xf32>
      %45 = arith.addf %44, %43 : vector<64x1xf32>
      %46 = arith.divf %44, %45 : vector<64x1xf32>
      %c0_23 = arith.constant 0 : index
      %c0_24 = arith.constant 0 : index
      %c0_25 = arith.constant 0 : index
      %47 = vector.load %arg5[%c0_23, %c0_24, %c0_25] : memref<1x64x1xf32, #tpu.memory_space<vmem>>, vector<1x64x1xf32>
      %48 = vector.shape_cast %47 : vector<1x64x1xf32> to vector<64x1xf32>
      %49 = vector.shape_cast %46 : vector<64x1xf32> to vector<1x64x1xf32>
      tpu.vector_store %arg5[%c0_23, %c0_24, %c0_25], %49 {strides = array<i32>} : memref<1x64x1xf32, #tpu.memory_space<vmem>>, vector<1x64x1xf32>,
    } else {
    }
    return
  }
  func.func @transform_0(%arg0: i32, %arg1: i32) -> (i32, i32, i32) {
    %c0_i32 = arith.constant 0 : i32
    %c0_i32_0 = arith.constant 0 : i32
    return %arg0, %c0_i32, %arg1 : i32, i32, i32
  }
  func.func @transform_1(%arg0: i32, %arg1: i32) -> (i32, i32) {
    %c0_i32 = arith.constant 0 : i32
    %c0_i32_0 = arith.constant 0 : i32
    %c0_i32_1 = arith.constant 0 : i32
    return %c0_i32, %c0_i32_0 : i32, i32
  }
  func.func @transform_2(%arg0: i32, %arg1: i32) -> (i32, i32) {
    %c0_i32 = arith.constant 0 : i32
    %c0_i32_0 = arith.constant 0 : i32
    %c0_i32_1 = arith.constant 0 : i32
    return %c0_i32, %c0_i32_0 : i32, i32
  }
  func.func @transform_3(%arg0: i32, %arg1: i32) -> (i32, i32, i32) {
    %c0_i32 = arith.constant 0 : i32
    %c0_i32_0 = arith.constant 0 : i32
    %c0_i32_1 = arith.constant 0 : i32
    return %arg0, %c0_i32, %c0_i32_0 : i32, i32, i32
  }
}

</mosaic_0001>

<bundles_post_ra>
// kernel: tpu_custom_call.1
= control target key start
LH: loop header
LB: loop body
LE: loop exit
PB: predicated region body
PF: predicated region fallthrough
CT: control target
= control target key end

     0   :  { %8 = vsyncpa [#allocation5], 0  ;;  %s1386_s0 = inlined_call_operand.hbm [shape: f32[2,64,256], index: 0, kind: input, shape index: {}]   ;;  %s1387_s1 = inlined_call_operand.vmem [shape: f32[64,4], index: 1, kind: input, shape index: {}]   ;;  %s1388_s2 = inlined_call_operand.vmem [shape: f32[64,4], index: 2, kind: input, shape index: {}]   ;;  %s1389_s3 = inlined_call_operand.vmem [shape: f32[2,64,1], index: 3, kind: output, shape index: {}]  }
   0x1   :  { %10 = vsyncpa [#allocation5 + $0x1], 0  ;;  %s1077_s12 = smov 0   ;;  %s1079_s13 = smov 0  }
   0x2   :  { %s1081_s14 = smov 0   ;;  %s1083_s15 = smov 0  }
   0x3   :  { %s1085_s16 = smov 0   ;;  %s1087_s17 = smov 0  }
   0x4   :  { %s1089_s18 = smov 0   ;;  %s1091_s19 = smov 0  }
   0x5 LB: > { %s820_s20 = sadd.s32 4294967295, %s1051_s19   ;;  %s25_s21 = sadd.s32 1, %s1043_s17  ;;  %s1051_s19 = sphi %s1091_s19, %s16_s19   ;;  %s1047_s18 = sphi %s1089_s18, %s1398_s18   ;;  %s1043_s17 = sphi %s1087_s17, %s1397_s17   ;;  %s1039_s16 = sphi %s1085_s16, %s1396_s16   ;;  %s1035_s15 = sphi %s1083_s15, %s1395_s15   ;;  %s1031_s14 = sphi %s1081_s14, %s1394_s14   ;;  %s1027_s13 = sphi %s1079_s13, %s1393_s13   ;;  %s1023_s12 = sphi %s1077_s12, %s1392_s12  }
   0x6   : > { %p26_p0 = scmp.ge.s32.totalorder %s25_s21, 2  ;;  %s28_s22 = sadd.s32 1, %s1047_s18 }
   0x7   : > { %s37_s23 = sadd.s32 1, %s1031_s14  ;;  %p44_p1 = scmp.ne.s32.totalorder %s1031_s14, %s1027_s13 }
   0x8   : > { %s1400_s21 = smov (%p26_p0, %s25_s21), 0  ;;  %s1402_s22 = smov (!%p26_p0, %s28_s22), %s1047_s18 }
   0x9   : > { %s33_s24 = ssub.s32 %s1043_s17, %s1400_s21  ;;  %p45_p2 = scmp.eq.s32.totalorder %s1051_s19, 0 }
   0xa   : > { %p30_p3 = scmp.ge.s32.totalorder %s1402_s22, 2  ;;  %p50_p4 = scmp.ne.s32.totalorder %s1027_s13, %s1023_s12 }
   0xb   : > { %p1128_p5 = por %p45_p2, %p44_p1  ;;  %p51_p6 = scmp.eq.s32.totalorder %s820_s20, 0 }
   0xc   : > { %s1404_s22 = smov (%p30_p3, %s1402_s22), 0  ;;  %p851_p8 = scmp.lt.s32.totalorder %s1051_s19, 4 }
   0xd   : > { %p1134_p7 = por %p51_p6, %p50_p4  ;;  %s32_s27 = ssub.s32 %s1047_s18, %s1404_s22 }
   0xe   : > { %s34_s28 = sor.u32 %s33_s24, %s32_s27  ;;  %s148_s29 = sand.u32 1, %s1031_s14  }
   0xf   : > { %p35_p9 = scmp.eq.s32.totalorder %s34_s28, 0  ;;  %s824_s30 = sshll.u32 %s148_s29, 6 }
  0x10   : > { %s825_s4 = sshll.u32 %s1047_s18, 4  ;;  %s152_s8 = scalar_lea.vmem [#allocation4], %s824_s30 }
  0x11   : > { %s1144_s5 = scalar_select %p35_p9, %s1031_s14, %s37_s23  }
  0x12   : > { %s156_s6 = sadd.s32 %s1043_s17, %s825_s4  ;;  %s161_s9 = sshll.u32 %s152_s8, 4  ;;  %s162_s9 = int_to_ptr.vmem [resolvable:$true] %s161_s9 }
  0x13   : > { %s826_s7 = sshll.u32 %s156_s6, 3  ;;  %p848_p10 = pnand %p851_p8, %p1128_p5 }
  0x14   : > { %s158_s12 = scalar_lea.hbm %s1386_s0, %s826_s7  ;;  %p827_p11 = scmp.ge.s32.totalorder %s1051_s19, 1 }
  0x15   : > { %s159_s20 = sshll.u32 %s158_s12, 4  ;;  %s149_s24 = scalar_lea.sflag [#allocation5], %s148_s29  ;;  %s160_s20 = int_to_ptr.hbm [resolvable:$true] %s159_s20 }
  0x16   : > { %s1053_s27 = smov 256   ;;  %s1054_s23 = smov 128  }
  0x17   : > { %s1055_s28 = smov 8   ;;  %p169_p12 = scmp.lt.s32.totalorder %s1051_s19, 5 }
  0x18   : > { %850 = dma.hbm_to_vmem [thread:$0]  (!%p848_p10), %s160_s20, 1024, %s162_s9, %s149_s24, %s1053_s27, %s1054_s23, %s1055_s28  }
  0x19   : > { %p170_p13 = pnand %p827_p11, %p169_p12 }
  0x1a   : > { %s175_s30 = sand.u32 (!%p170_p13), 1, %s1027_s13  }
  0x1b   : > { %173 = sbr.rel (%p170_p13) target bundleno = 608 (0x260), region = 32  ;;  %s828_s4 = sshll.u32 (!%p170_p13), %s175_s30, 6 }
  0x1c   : > { %s176_s6 = scalar_lea.sflag (!%p170_p13), [#allocation5], %s175_s30  ;;  %s179_s7 = scalar_lea.vmem (!%p170_p13), [#allocation4], %s828_s4 }
  0x20   : > { %1018 = dma.done.wait (%p1134_p7), %s176_s6, 1024  }
  0x21   : > { %1020 = vsyncadd (%p1134_p7), %s176_s6, 4294966272  ;;  %v208_v0 = vld [vmem:[%s179_s7] sm:$0xff]  ;;  %v210_v2 = vld [vmem:[%s179_s7 + $0x10] sm:$0xff]  ;;  %p203_p0 = scmp.lt.s32.totalorder %s1039_s16, 1  ;;  %p831_p1 = scmp.ne.s32.totalorder %s1035_s15, 0 }
  0x22   : > { %v212_v1 = vld [vmem:[%s179_s7 + $0x20] sm:$0xff]  ;;  %216 = vadd.xlane.f32.xlu0 %v208_v0  ;;  %220 = vadd.xlane.f32.xlu1 %v210_v2  ;;  %v209_v3 = vld [vmem:[%s179_s7 + $0x8] sm:$0xff]  ;;  %v211_v5 = vld [vmem:[%s179_s7 + $0x18] sm:$0xff] }
  0x23   : > { %224 = vadd.xlane.f32.xlu2 %v212_v1  ;;  %v213_v4 = vld [vmem:[%s179_s7 + $0x28] sm:$0xff]  ;;  %v214_v6 = vld [vmem:[%s179_s7 + $0x30] sm:$0xff]  ;;  %v215_v7 = vld [vmem:[%s179_s7 + $0x38] sm:$0xff]  ;;  %s1406_s16 = smov (!%p203_p0, %s1039_s16), 1 }
  0x24   : > { %s844_s25 = sshll.u32 %s1406_s16, 6 }
  0x25   : > { %s1166_s8 = scalar_lea.vmem %s1389_s3, %s844_s25 }
  0x2a   : > { %218 = vadd.xlane.f32.xlu0 %v209_v3  ;;  %222 = vadd.xlane.f32.xlu1 %v211_v5 }
  0x2b   : > { %226 = vadd.xlane.f32.xlu2 %v213_v4 }
  0x32   : > { %228 = vadd.xlane.f32.xlu0 %v214_v6  ;;  %230 = vadd.xlane.f32.xlu1 %v215_v7 }
  0x33   : > { %232 = vmax.xlane.f32.xlu2 %v208_v0 }
  0x3a   : > { %234 = vmax.xlane.f32.xlu0 %v209_v3  ;;  %236 = vmax.xlane.f32.xlu1 %v210_v2 }
  0x3b   : > { %238 = vmax.xlane.f32.xlu2 %v211_v5 }
  0x42   : > { %240 = vmax.xlane.f32.xlu0 %v212_v1  ;;  %242 = vmax.xlane.f32.xlu1 %v213_v4 }
  0x43   : > { %244 = vmax.xlane.f32.xlu2 %v214_v6 }
  0x4a   : > { %246 = vmax.xlane.f32.xlu0 %v215_v7 }
  0x95   : > { %v217_v8 = vpop.xlane.xlu0 %216  ;;  %v221_v10 = vpop.xlane.xlu1 %220 }
  0x96   : > { %v225_v9 = vpop.xlane.xlu2 %224 }
  0x9d   : > { %v219_v11 = vpop.xlane.xlu0 %218  ;;  %v223_v13 = vpop.xlane.xlu1 %222 }
  0x9e   : > { %v227_v12 = vpop.xlane.xlu2 %226 }
  0xa5   : > { %v229_v14 = vpop.xlane.xlu0 %228  ;;  %v231_v16 = vpop.xlane.xlu1 %230 }
  0xa6   : > { %v1168_v15 = vpop.xlane.xlu2 %232 }
  0xad   : > { %v1170_v17 = vpop.xlane.xlu0 %234  ;;  %v1174_v19 = vpop.xlane.xlu1 %236 }
  0xae   : > { %v1172_v18 = vpop.xlane.xlu2 %238 }
  0xb5   : > { %v1176_v20 = vpop.xlane.xlu0 %240  ;;  %v1180_v22 = vpop.xlane.xlu1 %242 }
  0xb6   : > { %v1178_v21 = vpop.xlane.xlu2 %244 }
  0xb9   : > { %251 = sbr.rel (%p831_p1) target bundleno = 207 (0xcf), region = 40 }
  0xbd   : > { %v1182_v23 = vpop.xlane.xlu0 %246 }
  0xbe   : > { %vm252_vm0 = vcmask 7168  }
  0xbf   : > { %253 = vst.msk [vmem:[#allocation2] sm:$0xff] %vm252_vm0, %v217_v8 }
  0xc0   : > { %254 = vst.msk [vmem:[#allocation2 + $0x8] sm:$0xff] %vm252_vm0, %v219_v11 }
  0xc1   : > { %255 = vst.msk [vmem:[#allocation2 + $0x10] sm:$0xff] %vm252_vm0, %v221_v10 }
  0xc2   : > { %256 = vst.msk [vmem:[#allocation2 + $0x18] sm:$0xff] %vm252_vm0, %v223_v13 }
  0xc3   : > { %257 = vst.msk [vmem:[#allocation2 + $0x20] sm:$0xff] %vm252_vm0, %v225_v9 }
  0xc4   : > { %258 = vst.msk [vmem:[#allocation2 + $0x28] sm:$0xff] %vm252_vm0, %v227_v12 }
  0xc5   : > { %259 = vst.msk [vmem:[#allocation2 + $0x30] sm:$0xff] %vm252_vm0, %v229_v14 }
  0xc6   : > { %260 = vst.msk [vmem:[#allocation2 + $0x38] sm:$0xff] %vm252_vm0, %v231_v16 }
  0xc7   : > { %261 = vst.msk [vmem:[#allocation3] sm:$0xff] %vm252_vm0, %v1168_v15 }
  0xc8   : > { %262 = vst.msk [vmem:[#allocation3 + $0x8] sm:$0xff] %vm252_vm0, %v1170_v17 }
  0xc9   : > { %263 = vst.msk [vmem:[#allocation3 + $0x10] sm:$0xff] %vm252_vm0, %v1174_v19 }
  0xca   : > { %264 = vst.msk [vmem:[#allocation3 + $0x18] sm:$0xff] %vm252_vm0, %v1172_v18 }
  0xcb   : > { %265 = vst.msk [vmem:[#allocation3 + $0x20] sm:$0xff] %vm252_vm0, %v1176_v20 }
  0xcc   : > { %266 = vst.msk [vmem:[#allocation3 + $0x28] sm:$0xff] %vm252_vm0, %v1180_v22 }
  0xcd   : > { %267 = vst.msk [vmem:[#allocation3 + $0x30] sm:$0xff] %vm252_vm0, %v1178_v21 }
  0xce   : > { %268 = vst.msk [vmem:[#allocation3 + $0x38] sm:$0xff] %vm252_vm0, %v1182_v23 }
  0xcf PF: > { %p832_p2 = scmp.eq.s32.totalorder %s1035_s15, 0 }
  0xd1   : > { %272 = sbr.rel (%p832_p2) target bundleno = 233 (0xe9), region = 44 }
  0xd6   : > { %v273_v24 = vld [vmem:[#allocation2] sm:$0xff]  ;;  %vm289_vm1 = vcmask 7168   ;;  %v274_v25 = vld [vmem:[#allocation2 + $0x8] sm:$0xff]  ;;  %v275_v26 = vld [vmem:[#allocation2 + $0x10] sm:$0xff] }
  0xd7   : > { %v281_v27 = vadd.f32 %v273_v24, %v217_v8  ;;  %v282_v28 = vadd.f32 %v274_v25, %v219_v11  ;;  %v283_v29 = vadd.f32 %v275_v26, %v221_v10  ;;  %v276_v30 = vld [vmem:[#allocation2 + $0x18] sm:$0xff]  ;;  %v277_v31 = vld [vmem:[#allocation2 + $0x20] sm:$0xff]  ;;  %v278_v32 = vld [vmem:[#allocation2 + $0x28] sm:$0xff] }
  0xd8   : > { %v284_v33 = vadd.f32 %v276_v30, %v223_v13  ;;  %v279_v34 = vld [vmem:[#allocation2 + $0x30] sm:$0xff]  ;;  %v285_v35 = vadd.f32 %v277_v31, %v225_v9  ;;  %v280_v36 = vld [vmem:[#allocation2 + $0x38] sm:$0xff]  ;;  %v286_v37 = vadd.f32 %v278_v32, %v227_v12  ;;  %v298_v38 = vld [vmem:[#allocation3] sm:$0xff] }
  0xd9   : > { %290 = vst.msk [vmem:[#allocation2] sm:$0xff] %vm289_vm1, %v281_v27  ;;  %v287_v39 = vadd.f32 %v279_v34, %v229_v14  ;;  %v299_v40 = vld [vmem:[#allocation3 + $0x8] sm:$0xff]  ;;  %v288_v41 = vadd.f32 %v280_v36, %v231_v16  ;;  %v300_v42 = vld [vmem:[#allocation3 + $0x10] sm:$0xff]  ;;  %v306_v43 = vmax.f32 %v298_v38, %v1168_v15  ;;  %v301_v44 = vld [vmem:[#allocation3 + $0x18] sm:$0xff] }
  0xda   : > { %291 = vst.msk [vmem:[#allocation2 + $0x8] sm:$0xff] %vm289_vm1, %v282_v28  ;;  %v307_v45 = vmax.f32 %v299_v40, %v1170_v17  ;;  %v302_v46 = vld [vmem:[#allocation3 + $0x20] sm:$0xff]  ;;  %v308_v47 = vmax.f32 %v300_v42, %v1174_v19  ;;  %v303_v48 = vld [vmem:[#allocation3 + $0x28] sm:$0xff]  ;;  %v309_v49 = vmax.f32 %v301_v44, %v1172_v18  ;;  %v304_v50 = vld [vmem:[#allocation3 + $0x30] sm:$0xff] }
  0xdb   : > { %292 = vst.msk [vmem:[#allocation2 + $0x10] sm:$0xff] %vm289_vm1, %v283_v29  ;;  %v310_v51 = vmax.f32 %v302_v46, %v1176_v20  ;;  %v305_v52 = vld [vmem:[#allocation3 + $0x38] sm:$0xff]  ;;  %v311_v53 = vmax.f32 %v303_v48, %v1180_v22  ;;  %v312_v54 = vmax.f32 %v304_v50, %v1178_v21 }
  0xdc   : > { %293 = vst.msk [vmem:[#allocation2 + $0x18] sm:$0xff] %vm289_vm1, %v284_v33  ;;  %v313_v55 = vmax.f32 %v305_v52, %v1182_v23 }
  0xdd   : > { %294 = vst.msk [vmem:[#allocation2 + $0x20] sm:$0xff] %vm289_vm1, %v285_v35 }
  0xde   : > { %295 = vst.msk [vmem:[#allocation2 + $0x28] sm:$0xff] %vm289_vm1, %v286_v37 }
  0xdf   : > { %296 = vst.msk [vmem:[#allocation2 + $0x30] sm:$0xff] %vm289_vm1, %v287_v39 }
  0xe0   : > { %297 = vst.msk [vmem:[#allocation2 + $0x38] sm:$0xff] %vm289_vm1, %v288_v41 }
  0xe1   : > { %314 = vst.msk [vmem:[#allocation3] sm:$0xff] %vm289_vm1, %v306_v43 }
  0xe2   : > { %315 = vst.msk [vmem:[#allocation3 + $0x8] sm:$0xff] %vm289_vm1, %v307_v45 }
  0xe3   : > { %316 = vst.msk [vmem:[#allocation3 + $0x10] sm:$0xff] %vm289_vm1, %v308_v47 }
  0xe4   : > { %317 = vst.msk [vmem:[#allocation3 + $0x18] sm:$0xff] %vm289_vm1, %v309_v49 }
  0xe5   : > { %318 = vst.msk [vmem:[#allocation3 + $0x20] sm:$0xff] %vm289_vm1, %v310_v51 }
  0xe6   : > { %319 = vst.msk [vmem:[#allocation3 + $0x28] sm:$0xff] %vm289_vm1, %v311_v53 }
  0xe7   : > { %320 = vst.msk [vmem:[#allocation3 + $0x30] sm:$0xff] %vm289_vm1, %v312_v54 }
  0xe8   : > { %321 = vst.msk [vmem:[#allocation3 + $0x38] sm:$0xff] %vm289_vm1, %v313_v55 }
  0xe9 PF: > { %p833_p3 = scmp.ne.s32.totalorder %s1035_s15, 1 }
  0xeb   : > { %325 = sbr.rel (%p833_p3) target bundleno = 608 (0x260), region = 48 }
  0xf0   : > { %v328_v56 = vld [vmem:[#allocation2 + $0x10] sm:$0xff]  ;;  %v326_v57 = vld [vmem:[#allocation2] sm:$0xff]  ;;  %v1056_v59 = vmov 0   ;;  %v329_v63 = vld [vmem:[#allocation2 + $0x18] sm:$0xff]  ;;  %vm414_vm2 = vcmask 31744   ;;  %vm731_vm5 = vcmask 7168  }
  0xf1   : > { %v330_v58 = vld [vmem:[#allocation2 + $0x20] sm:$0xff]  ;;  %921 = vset.pattern.permute.xlu1 %v1056_v59  ;;  %920 = vset.pattern.permute.xlu0 %v1056_v59  ;;  %v336_v60 = vmul.f32 0.00390625, %v328_v56  ;;  %v334_v61 = vmul.f32 0.00390625, %v326_v57  ;;  %v327_v0 = vld [vmem:[#allocation2 + $0x8] sm:$0xff]  ;;  %v337_v2 = vmul.f32 0.00390625, %v329_v63  ;;  %v344_v7 = vld [vmem:[#allocation3 + $0x10] sm:$0xff] }
  0xf2   : > { %v338_v62 = vmul.f32 0.00390625, %v330_v58  ;;  %922 = vset.pattern.permute.xlu2 %v1056_v59  ;;  %v331_v1 = vld [vmem:[#allocation2 + $0x28] sm:$0xff]  ;;  %v335_v3 = vmul.f32 0.00390625, %v327_v0  ;;  %v342_v6 = vld [vmem:[#allocation3] sm:$0xff]  ;;  %v345_v9 = vld [vmem:[#allocation3 + $0x18] sm:$0xff] }
  0xf3   : > { %378 = vperm.xlu1 %921, %v336_v60   ;;  %368 = vperm.xlu0 %920, %v334_v61   ;;  %v339_v4 = vmul.f32 0.00390625, %v331_v1  ;;  %v343_v5 = vld [vmem:[#allocation3 + $0x8] sm:$0xff]  ;;  %v346_v8 = vld [vmem:[#allocation3 + $0x20] sm:$0xff]  ;;  %v332_v11 = vld [vmem:[#allocation2 + $0x30] sm:$0xff] }
  0xf4   : > { %388 = vperm.xlu2 %922, %v338_v62   ;;  %v347_v10 = vld [vmem:[#allocation3 + $0x28] sm:$0xff]  ;;  %v333_v12 = vld [vmem:[#allocation2 + $0x38] sm:$0xff]  ;;  %v340_v13 = vmul.f32 0.00390625, %v332_v11  ;;  %v348_v14 = vld [vmem:[#allocation3 + $0x30] sm:$0xff] }
  0xf5   : > { %v341_v15 = vmul.f32 0.00390625, %v333_v12  ;;  %v349_v16 = vld [vmem:[#allocation3 + $0x38] sm:$0xff]  ;;  %v351_v22 = vld [vmem:[%s1387_s1 + $0x8] sm:$0xff]  ;;  %v350_v25 = vld [vmem:[%s1387_s1] sm:$0xff] }
  0xf6   : > { %v352_v28 = vld [vmem:[%s1387_s1 + $0x10] sm:$0xff]  ;;  %v353_v34 = vld [vmem:[%s1387_s1 + $0x18] sm:$0xff]  ;;  %v354_v41 = vld [vmem:[%s1387_s1 + $0x20] sm:$0xff] }
  0xf7   : > { %v355_v51 = vld [vmem:[%s1387_s1 + $0x28] sm:$0xff]  ;;  %v357_v58 = vld [vmem:[%s1387_s1 + $0x38] sm:$0xff]  ;;  %v356_v61 = vld [vmem:[%s1387_s1 + $0x30] sm:$0xff] }
  0xfb   : > { %383 = vperm.xlu1 %921, %v337_v2   ;;  %373 = vperm.xlu0 %920, %v335_v3  }
  0xfc   : > { %393 = vperm.xlu2 %922, %v339_v4  }
 0x103   : > { %476 = vperm.xlu1 %921, %v343_v5   ;;  %471 = vperm.xlu0 %920, %v342_v6  }
 0x104   : > { %481 = vperm.xlu2 %922, %v344_v7  }
 0x10b   : > { %491 = vperm.xlu1 %921, %v346_v8   ;;  %486 = vperm.xlu0 %920, %v345_v9  }
 0x10c   : > { %496 = vperm.xlu2 %922, %v347_v10  }
 0x113   : > { %501 = vperm.xlu1 %921, %v348_v14   ;;  %398 = vperm.xlu0 %920, %v340_v13  }
 0x114   : > { %403 = vperm.xlu2 %922, %v341_v15  }
 0x11b   : > { %506 = vperm.xlu0 %920, %v349_v16  }
 0x14e   : > { %v389_v17 = vpop.permute.xlu2 %388 }
 0x14f   : > { %v410_v47 = vmul.f32 %v389_v17, %v354_v41 }
 0x151   : > { %v422_v54 = vsel %vm414_vm2, %v410_v47, 0.0 }
 0x156   : > { %v394_v18 = vpop.permute.xlu2 %393 }
 0x157   : > { %v411_v55 = vmul.f32 %v394_v18, %v355_v51 }
 0x159   : > { %v424_v3 = vsel %vm414_vm2, %v411_v55, 0.0 }
 0x15e   : > { %v482_v24 = vpop.permute.xlu2 %481 }
 0x15f   : > { %v511_v48 = vmul.f32 %v482_v24, %v352_v28 }
 0x161   : > { %v520_v56 = vsel %vm414_vm2, %v511_v48, 0.0 }
 0x165   : > { %v379_v19 = vpop.permute.xlu1 %378  ;;  %v369_v20 = vpop.permute.xlu0 %368 }
 0x166   : > { %v406_v27 = vmul.f32 %v369_v20, %v350_v25  ;;  %v408_v32 = vmul.f32 %v379_v19, %v352_v28  ;;  %v497_v38 = vpop.permute.xlu2 %496 }
 0x167   : > { %v514_v7 = vmul.f32 %v497_v38, %v355_v51  ;;  %v358_v38 = vld [vmem:[%s1388_s2] sm:$0xff] }
 0x168   : > { %v415_v33 = vsel %vm414_vm2, %v406_v27, 0.0  ;;  %v418_v39 = vsel %vm414_vm2, %v408_v32, 0.0 }
 0x169   : > { %v526_v15 = vsel %vm414_vm2, %v514_v7, 0.0 }
 0x16d   : > { %v384_v21 = vpop.permute.xlu1 %383  ;;  %v374_v23 = vpop.permute.xlu0 %373 }
 0x16e   : > { %v407_v26 = vmul.f32 %v374_v23, %v351_v22  ;;  %v409_v40 = vmul.f32 %v384_v21, %v353_v34  ;;  %v404_v59 = vpop.permute.xlu2 %403 }
 0x16f   : > { %v413_v4 = vmul.f32 %v404_v59, %v357_v58 }
 0x170   : > { %v416_v29 = vsel %vm414_vm2, %v407_v26, 0.0  ;;  %v420_v49 = vsel %vm414_vm2, %v409_v40, 0.0 }
 0x171   : > { %v417_v35 = vadd.f32 %v416_v29, %v415_v33  ;;  %v428_v13 = vsel %vm414_vm2, %v413_v4, 0.0  ;;  %v363_v4 = vld [vmem:[%s1388_s2 + $0x28] sm:$0xff] }
 0x173   : > { %v419_v42 = vadd.f32 %v418_v39, %v417_v35 }
 0x175   : > { %v477_v30 = vpop.permute.xlu1 %476  ;;  %v472_v31 = vpop.permute.xlu0 %471  ;;  %v421_v52 = vadd.f32 %v420_v49, %v419_v42  ;;  %v361_v49 = vld [vmem:[%s1388_s2 + $0x18] sm:$0xff] }
 0x176   : > { %v510_v36 = vmul.f32 %v477_v30, %v351_v22  ;;  %v509_v37 = vmul.f32 %v472_v31, %v350_v25 }
 0x177   : > { %v423_v62 = vadd.f32 %v422_v54, %v421_v52 }
 0x178   : > { %v518_v43 = vsel %vm414_vm2, %v510_v36, 0.0  ;;  %v517_v44 = vsel %vm414_vm2, %v509_v37, 0.0  ;;  %v360_v36 = vld [vmem:[%s1388_s2 + $0x10] sm:$0xff]  ;;  %v359_v37 = vld [vmem:[%s1388_s2 + $0x8] sm:$0xff] }
 0x179   : > { %v519_v53 = vadd.f32 %v518_v43, %v517_v44  ;;  %v425_v6 = vadd.f32 %v424_v3, %v423_v62 }
 0x17b   : > { %v521_v60 = vadd.f32 %v520_v56, %v519_v53 }
 0x17d   : > { %v492_v45 = vpop.permute.xlu1 %491  ;;  %v487_v46 = vpop.permute.xlu0 %486 }
 0x17e   : > { %v512_v50 = vmul.f32 %v487_v46, %v353_v34  ;;  %v513_v63 = vmul.f32 %v492_v45, %v354_v41  ;;  %v362_v46 = vld [vmem:[%s1388_s2 + $0x20] sm:$0xff] }
 0x180   : > { %v522_v57 = vsel %vm414_vm2, %v512_v50, 0.0  ;;  %v524_v8 = vsel %vm414_vm2, %v513_v63, 0.0 }
 0x181   : > { %v523_v0 = vadd.f32 %v522_v57, %v521_v60  ;;  %v365_v60 = vld [vmem:[%s1388_s2 + $0x38] sm:$0xff] }
 0x183   : > { %v525_v11 = vadd.f32 %v524_v8, %v523_v0 }
 0x185   : > { %v502_v1 = vpop.permute.xlu1 %501  ;;  %v399_v2 = vpop.permute.xlu0 %398  ;;  %v527_v17 = vadd.f32 %v526_v15, %v525_v11 }
 0x186   : > { %v412_v5 = vmul.f32 %v399_v2, %v356_v61  ;;  %v515_v9 = vmul.f32 %v502_v1, %v356_v61  ;;  %v364_v61 = vld [vmem:[%s1388_s2 + $0x30] sm:$0xff] }
 0x188   : > { %v426_v10 = vsel %vm414_vm2, %v412_v5, 0.0  ;;  %v528_v16 = vsel %vm414_vm2, %v515_v9, 0.0 }
 0x189   : > { %v427_v12 = vadd.f32 %v426_v10, %v425_v6  ;;  %v529_v21 = vadd.f32 %v528_v16, %v527_v17 }
 0x18b   : > { %v429_v14 = vadd.f32 %v428_v13, %v427_v12 }
 0x18d   : > { %v430_v18 = vrot.slane %v429_v14, 4  ;;  %v507_v19 = vpop.permute.xlu0 %506 }
 0x18e   : > { %v516_v20 = vmul.f32 %v507_v19, %v357_v58 }
 0x18f   : > { %v431_v22 = vadd.f32 %v430_v18, %v429_v14 }
 0x190   : > { %v530_v23 = vsel %vm414_vm2, %v516_v20, 0.0 }
 0x191   : > { %v531_v24 = vadd.f32 %v530_v23, %v529_v21  ;;  %v432_v25 = vrot.slane %v431_v22, 2 }
 0x193   : > { %v532_v26 = vrot.slane %v531_v24, 4  ;;  %v433_v28 = vadd.f32 %v432_v25, %v431_v22 }
 0x195   : > { %v533_v27 = vadd.f32 %v532_v26, %v531_v24  ;;  %v434_v31 = vrot.slane %v433_v28, 1 }
 0x197   : > { %v534_v29 = vrot.slane %v533_v27, 2  ;;  %v435_v34 = vadd.f32 %v434_v31, %v433_v28 }
 0x199   : > { %v535_v30 = vadd.f32 %v534_v29, %v533_v27  ;;  %v436_v42 = vmax.f32 %v435_v34, 0.0 }
 0x19b   : > { %v536_v32 = vrot.slane %v535_v30, 1  ;;  %v437_v47 = vmul.f32 %v436_v42, %v358_v38  ;;  %v441_v54 = vmul.f32 %v436_v42, %v362_v46  ;;  %v439_v55 = vmul.f32 %v436_v42, %v360_v36 }
 0x19c   : > { %v438_v56 = vmul.f32 %v436_v42, %v359_v37  ;;  %v444_v62 = vmul.f32 %v436_v42, %v365_v60  ;;  %v443_v63 = vmul.f32 %v436_v42, %v364_v61  ;;  %v440_v0 = vmul.f32 %v436_v42, %v361_v49 }
 0x19d   : > { %v537_v33 = vadd.f32 %v536_v32, %v535_v30  ;;  %v445_v51 = vsel %vm414_vm2, %v437_v47, 0.0  ;;  %v457_v57 = vsel %vm414_vm2, %v441_v54, 0.0  ;;  %v451_v58 = vsel %vm414_vm2, %v439_v55, 0.0 }
 0x19e   : > { %v448_v59 = vsel %vm414_vm2, %v438_v56, 0.0  ;;  %v466_v1 = vsel %vm414_vm2, %v444_v62, 0.0  ;;  %v463_v2 = vsel %vm414_vm2, %v443_v63, 0.0  ;;  %v454_v3 = vsel %vm414_vm2, %v440_v0, 0.0 }
 0x19f   : > { %v538_v35 = vmax.f32 %v537_v33, 0.0  ;;  %v442_v7 = vmul.f32 %v436_v42, %v363_v4 }
 0x1a1   : > { %v541_v39 = vmul.f32 %v538_v35, %v360_v36  ;;  %v540_v40 = vmul.f32 %v538_v35, %v359_v37  ;;  %v539_v41 = vmul.f32 %v538_v35, %v358_v38  ;;  %v543_v48 = vmul.f32 %v538_v35, %v362_v46 }
 0x1a2   : > { %v542_v50 = vmul.f32 %v538_v35, %v361_v49  ;;  %v544_v5 = vmul.f32 %v538_v35, %v363_v4  ;;  %v546_v6 = vmul.f32 %v538_v35, %v365_v60  ;;  %v460_v10 = vsel %vm414_vm2, %v442_v7, 0.0 }
 0x1a3   : > { %v553_v43 = vsel %vm414_vm2, %v541_v39, 0.0  ;;  %v550_v44 = vsel %vm414_vm2, %v540_v40, 0.0  ;;  %v547_v45 = vsel %vm414_vm2, %v539_v41, 0.0  ;;  %v559_v52 = vsel %vm414_vm2, %v543_v48, 0.0 }
 0x1a4   : > { %554 = vadd.xlane.f32.xlu1 %v553_v43  ;;  %551 = vadd.xlane.f32.xlu0 %v550_v44  ;;  %v556_v53 = vsel %vm414_vm2, %v542_v50, 0.0  ;;  %v562_v8 = vsel %vm414_vm2, %v544_v5, 0.0  ;;  %v568_v9 = vsel %vm414_vm2, %v546_v6, 0.0  ;;  %v545_v11 = vmul.f32 %v538_v35, %v364_v61 }
 0x1a5   : > { %548 = vadd.xlane.f32.xlu2 %v547_v45 }
 0x1a6   : > { %v565_v12 = vsel %vm414_vm2, %v545_v11, 0.0 }
 0x1ac   : > { %446 = vadd.xlane.f32.xlu1 %v445_v51  ;;  %560 = vadd.xlane.f32.xlu0 %v559_v52 }
 0x1ad   : > { %557 = vadd.xlane.f32.xlu2 %v556_v53 }
 0x1b4   : > { %458 = vadd.xlane.f32.xlu1 %v457_v57  ;;  %452 = vadd.xlane.f32.xlu0 %v451_v58 }
 0x1b5   : > { %449 = vadd.xlane.f32.xlu2 %v448_v59 }
 0x1bc   : > { %467 = vadd.xlane.f32.xlu1 %v466_v1  ;;  %464 = vadd.xlane.f32.xlu0 %v463_v2 }
 0x1bd   : > { %455 = vadd.xlane.f32.xlu2 %v454_v3 }
 0x1c4   : > { %563 = vadd.xlane.f32.xlu1 %v562_v8  ;;  %569 = vadd.xlane.f32.xlu0 %v568_v9 }
 0x1c5   : > { %461 = vadd.xlane.f32.xlu2 %v460_v10 }
 0x1cd   : > { %566 = vadd.xlane.f32.xlu2 %v565_v12 }
 0x217   : > { %v555_v13 = vpop.xlane.xlu1 %554  ;;  %v552_v14 = vpop.xlane.xlu0 %551 }
 0x218   : > { %v549_v15 = vpop.xlane.xlu2 %548 }
 0x21f   : > { %v447_v16 = vpop.xlane.xlu1 %446  ;;  %v561_v17 = vpop.xlane.xlu0 %560 }
 0x220   : > { %v571_v18 = vadd.f32 %v549_v15, %v447_v16  ;;  %v558_v19 = vpop.xlane.xlu2 %557 }
 0x222   : > { %v834_v20 = vmul.f32 -1.442695, %v571_v18 }
 0x224   : > { %923 = vpow2.f32 %v834_v20 }
 0x227   : > { %v459_v21 = vpop.xlane.xlu1 %458  ;;  %v453_v22 = vpop.xlane.xlu0 %452 }
 0x228   : > { %v575_v23 = vadd.f32 %v561_v17, %v459_v21  ;;  %v573_v24 = vadd.f32 %v555_v13, %v453_v22  ;;  %v450_v25 = vpop.xlane.xlu2 %449 }
 0x229   : > { %v572_v26 = vadd.f32 %v552_v14, %v450_v25 }
 0x22a   : > { %v924_v27 = vpop.eup %923  ;;  %v838_v28 = vmul.f32 -1.442695, %v575_v23  ;;  %v836_v29 = vmul.f32 -1.442695, %v573_v24 }
 0x22b   : > { %v603_v30 = vadd.f32 1.0, %v924_v27  ;;  %v835_v31 = vmul.f32 -1.442695, %v572_v26 }
 0x22c   : > { %925 = vpow2.f32 %v838_v28 }
 0x22d   : > { %927 = vrcp.f32 %v603_v30  ;;  %v622_v46 = vand.u32 2147483648, %v603_v30  ;;  %v620_v49 = vand.u32 2147483647, %v603_v30  ;;  %vm616_vm4 = vweird.f32 %v603_v30 }
 0x22e   : > { %929 = vpow2.f32 %v836_v29 }
 0x22f   : > { %931 = vpow2.f32 %v835_v31  ;;  %v468_v32 = vpop.xlane.xlu1 %467  ;;  %v465_v33 = vpop.xlane.xlu0 %464  ;;  %v623_v55 = vor.u32 1.1754944e-38, %v622_v46  ;;  %vm621_vm7 = vcmp.eq.f32.partialorder %v620_v49, 8.507059e+37 }
 0x230   : > { %v456_v34 = vpop.xlane.xlu2 %455 }
 0x231   : > { %v574_v35 = vadd.f32 %v558_v19, %v456_v34 }
 0x232   : > { %v926_v36 = vpop.eup %925 }
 0x233   : > { %v928_v37 = vpop.eup %927  ;;  %v1315_v38 = vadd.f32 1.0, %v926_v36  ;;  %v837_v39 = vmul.f32 -1.442695, %v574_v35 }
 0x234   : > { %v930_v40 = vpop.eup %929  ;;  %v612_v41 = vmul.f32 %v928_v37, %v603_v30  ;;  %vm617_vm3 = vweird.f32 %v928_v37 }
 0x235   : > { %v932_v42 = vpop.eup %931  ;;  %933 = vrcp.f32 %v1315_v38  ;;  %v1318_v44 = vadd.f32 1.0, %v930_v40  ;;  %vm618_vm6 = vmor %vm616_vm4, %vm617_vm3  ;;  %v682_v56 = vand.u32 2147483648, %v1315_v38  ;;  %vm676_vm8 = vweird.f32 %v1315_v38 }
 0x236   : > { %v613_v43 = vsub.f32 1.0, %v612_v41  ;;  %v1320_v45 = vadd.f32 1.0, %v932_v42  ;;  %935 = vpow2.f32 %v837_v39  ;;  %v680_v4 = vand.u32 2147483647, %v1315_v38 }
 0x237   : > { %v570_v47 = vpop.xlane.xlu0 %569  ;;  %937 = vrcp.f32 %v1318_v44  ;;  %v564_v50 = vpop.xlane.xlu1 %563  ;;  %v683_v5 = vor.u32 1.1754944e-38, %v682_v56  ;;  %v650_v8 = vand.u32 2147483647, %v1318_v44  ;;  %v652_v12 = vand.u32 2147483648, %v1318_v44 }
 0x238   : > { %v614_v48 = vmul.f32 %v928_v37, %v613_v43  ;;  %v462_v51 = vpop.xlane.xlu2 %461  ;;  %939 = vrcp.f32 %v1320_v45  ;;  %v578_v53 = vadd.f32 %v570_v47, %v468_v32  ;;  %v635_v16 = vand.u32 2147483647, %v1320_v45 }
 0x239   : > { %v576_v57 = vadd.f32 %v564_v50, %v462_v51  ;;  %v637_v18 = vand.u32 2147483648, %v1320_v45  ;;  %vm681_vm12 = vcmp.eq.f32.partialorder %v680_v4, 8.507059e+37  ;;  %vm646_vm14 = vweird.f32 %v1318_v44 }
 0x23a   : > { %v615_v52 = vadd.f32 %v928_v37, %v614_v48  ;;  %v841_v63 = vmul.f32 -1.442695, %v578_v53  ;;  %v653_v25 = vor.u32 1.1754944e-38, %v652_v12  ;;  %vm631_vm0 = vweird.f32 %v1320_v45 }
 0x23b   : > { %v934_v54 = vpop.eup %933  ;;  %v839_v2 = vmul.f32 -1.442695, %v576_v57  ;;  %vm651_vm1 = vcmp.eq.f32.partialorder %v650_v8, 8.507059e+37  ;;  %vm636_vm3 = vcmp.eq.f32.partialorder %v635_v16, 8.507059e+37  ;;  %v638_v30 = vor.u32 1.1754944e-38, %v637_v18 }
 0x23c   : > { %v936_v58 = vpop.eup %935  ;;  %v619_v59 = vsel %vm618_vm6, %v928_v37, %v615_v52  ;;  %v672_v60 = vmul.f32 %v934_v54, %v1315_v38  ;;  %vm677_vm9 = vweird.f32 %v934_v54 }
 0x23d   : > { %v624_v61 = vsel %vm621_vm7, %v623_v55, %v619_v59  ;;  %v1326_v62 = vadd.f32 1.0, %v936_v58  ;;  %v938_v0 = vpop.eup %937  ;;  %vm678_vm10 = vmor %vm676_vm8, %vm677_vm9 }
 0x23e   : > { %732 = vst.msk [vmem:[%s1166_s8] sm:$0xff] %vm731_vm5, %v624_v61  ;;  %v673_v1 = vsub.f32 1.0, %v672_v60  ;;  %v940_v3 = vpop.eup %939  ;;  %v642_v6 = vmul.f32 %v938_v0, %v1318_v44  ;;  %vm647_vm11 = vweird.f32 %v938_v0 }
 0x23f   : > { %941 = vrcp.f32 %v1326_v62  ;;  %v627_v9 = vmul.f32 %v940_v3, %v1320_v45  ;;  %vm632_vm13 = vweird.f32 %v940_v3  ;;  %vm648_vm15 = vmor %vm646_vm14, %vm647_vm11  ;;  %v667_v37 = vand.u32 2147483648, %v1326_v62 }
 0x240   : > { %v674_v7 = vmul.f32 %v934_v54, %v673_v1  ;;  %v567_v10 = vpop.xlane.xlu2 %566  ;;  %v643_v11 = vsub.f32 1.0, %v642_v6  ;;  %943 = vpow2.f32 %v841_v63  ;;  %vm633_vm2 = vmor %vm631_vm0, %vm632_vm13  ;;  %v665_v40 = vand.u32 2147483647, %v1326_v62 }
 0x241   : > { %v577_v13 = vadd.f32 %v567_v10, %v465_v33  ;;  %v628_v15 = vsub.f32 1.0, %v627_v9  ;;  %945 = vpow2.f32 %v839_v2  ;;  %vm661_vm6 = vweird.f32 %v1326_v62 }
 0x242   : > { %v675_v14 = vadd.f32 %v934_v54, %v674_v7  ;;  %v644_v17 = vmul.f32 %v938_v0, %v643_v11  ;;  %v668_v44 = vor.u32 1.1754944e-38, %v667_v37  ;;  %vm666_vm8 = vcmp.eq.f32.partialorder %v665_v40, 8.507059e+37 }
 0x243   : > { %v840_v19 = vmul.f32 -1.442695, %v577_v13  ;;  %v629_v21 = vmul.f32 %v940_v3, %v628_v15 }
 0x244   : > { %v679_v20 = vsel %vm678_vm10, %v934_v54, %v675_v14  ;;  %v645_v24 = vadd.f32 %v938_v0, %v644_v17 }
 0x245   : > { %v942_v22 = vpop.eup %941  ;;  %v684_v23 = vsel %vm681_vm12, %v683_v5, %v679_v20  ;;  %947 = vpow2.f32 %v840_v19  ;;  %v630_v26 = vadd.f32 %v940_v3, %v629_v21 }
 0x246   : > { %736 = vst.msk [vmem:[%s1166_s8 + $0x20] sm:$0xff] %vm731_vm5, %v684_v23  ;;  %v657_v27 = vmul.f32 %v942_v22, %v1326_v62  ;;  %v944_v28 = vpop.eup %943  ;;  %v649_v29 = vsel %vm648_vm15, %v938_v0, %v645_v24  ;;  %vm662_vm4 = vweird.f32 %v942_v22 }
 0x247   : > { %v946_v31 = vpop.eup %945  ;;  %v654_v32 = vsel %vm651_vm1, %v653_v25, %v649_v29  ;;  %v634_v33 = vsel %vm633_vm2, %v940_v3, %v630_v26  ;;  %v610_v35 = vadd.f32 1.0, %v944_v28  ;;  %vm663_vm7 = vmor %vm661_vm6, %vm662_vm4 }
 0x248   : > { %v658_v34 = vsub.f32 1.0, %v657_v27  ;;  %734 = vst.msk [vmem:[%s1166_s8 + $0x10] sm:$0xff] %vm731_vm5, %v654_v32  ;;  %v639_v36 = vsel %vm636_vm3, %v638_v30, %v634_v33  ;;  %v608_v38 = vadd.f32 1.0, %v946_v31 }
 0x249   : > { %733 = vst.msk [vmem:[%s1166_s8 + $0x8] sm:$0xff] %vm731_vm5, %v639_v36  ;;  %949 = vrcp.f32 %v610_v35  ;;  %v725_v52 = vand.u32 2147483647, %v610_v35  ;;  %v727_v54 = vand.u32 2147483648, %v610_v35  ;;  %vm721_vm10 = vweird.f32 %v610_v35 }
 0x24a   : > { %v659_v39 = vmul.f32 %v942_v22, %v658_v34  ;;  %951 = vrcp.f32 %v608_v38  ;;  %v697_v56 = vand.u32 2147483648, %v608_v38  ;;  %v695_v60 = vand.u32 2147483647, %v608_v38 }
 0x24b   : > { %v948_v41 = vpop.eup %947  ;;  %vm726_vm12 = vcmp.eq.f32.partialorder %v725_v52, 8.507059e+37  ;;  %vm691_vm13 = vweird.f32 %v608_v38  ;;  %v728_v63 = vor.u32 1.1754944e-38, %v727_v54 }
 0x24c   : > { %v660_v42 = vadd.f32 %v942_v22, %v659_v39  ;;  %v609_v43 = vadd.f32 1.0, %v948_v41  ;;  %v698_v1 = vor.u32 1.1754944e-38, %v697_v56  ;;  %vm696_vm1 = vcmp.eq.f32.partialorder %v695_v60, 8.507059e+37 }
 0x24e   : > { %v664_v45 = vsel %vm663_vm7, %v942_v22, %v660_v42  ;;  %953 = vrcp.f32 %v609_v43  ;;  %v712_v2 = vand.u32 2147483648, %v609_v43  ;;  %v710_v5 = vand.u32 2147483647, %v609_v43 }
 0x24f   : > { %v669_v46 = vsel %vm666_vm8, %v668_v44, %v664_v45  ;;  %v950_v47 = vpop.eup %949  ;;  %vm706_vm2 = vweird.f32 %v609_v43 }
 0x250   : > { %735 = vst.msk [vmem:[%s1166_s8 + $0x18] sm:$0xff] %vm731_vm5, %v669_v46  ;;  %v952_v48 = vpop.eup %951  ;;  %v717_v49 = vmul.f32 %v950_v47, %v610_v35  ;;  %vm722_vm9 = vweird.f32 %v950_v47  ;;  %v713_v10 = vor.u32 1.1754944e-38, %v712_v2  ;;  %vm711_vm4 = vcmp.eq.f32.partialorder %v710_v5, 8.507059e+37 }
 0x251   : > { %v687_v50 = vmul.f32 %v952_v48, %v608_v38  ;;  %vm692_vm11 = vweird.f32 %v952_v48  ;;  %vm723_vm14 = vmor %vm721_vm10, %vm722_vm9 }
 0x252   : > { %v718_v51 = vsub.f32 1.0, %v717_v49  ;;  %vm693_vm15 = vmor %vm691_vm13, %vm692_vm11 }
 0x253   : > { %v688_v55 = vsub.f32 1.0, %v687_v50 }
 0x254   : > { %v954_v53 = vpop.eup %953  ;;  %v719_v57 = vmul.f32 %v950_v47, %v718_v51 }
 0x255   : > { %v702_v58 = vmul.f32 %v954_v53, %v609_v43  ;;  %v689_v59 = vmul.f32 %v952_v48, %v688_v55  ;;  %vm707_vm0 = vweird.f32 %v954_v53 }
 0x256   : > { %v720_v61 = vadd.f32 %v950_v47, %v719_v57  ;;  %vm708_vm3 = vmor %vm706_vm2, %vm707_vm0 }
 0x257   : > { %v703_v62 = vsub.f32 1.0, %v702_v58  ;;  %v690_v0 = vadd.f32 %v952_v48, %v689_v59 }
 0x258   : > { %v724_v3 = vsel %vm723_vm14, %v950_v47, %v720_v61 }
 0x259   : > { %v704_v4 = vmul.f32 %v954_v53, %v703_v62  ;;  %v729_v6 = vsel %vm726_vm12, %v728_v63, %v724_v3  ;;  %v694_v7 = vsel %vm693_vm15, %v952_v48, %v690_v0 }
 0x25a   : > { %739 = vst.msk [vmem:[%s1166_s8 + $0x38] sm:$0xff] %vm731_vm5, %v729_v6  ;;  %v699_v8 = vsel %vm696_vm1, %v698_v1, %v694_v7 }
 0x25b   : > { %v705_v9 = vadd.f32 %v954_v53, %v704_v4  ;;  %737 = vst.msk [vmem:[%s1166_s8 + $0x28] sm:$0xff] %vm731_vm5, %v699_v8 }
 0x25d   : > { %v709_v11 = vsel %vm708_vm3, %v954_v53, %v705_v9 }
 0x25e   : > { %v714_v12 = vsel %vm711_vm4, %v713_v10, %v709_v11 }
 0x25f   : > { %738 = vst.msk [vmem:[%s1166_s8 + $0x30] sm:$0xff] %vm731_vm5, %v714_v12 }
 0x260 PF: > { %s16_s19 = sadd.s32 1, %s1051_s19   ;;  %s1392_s12 = smov %s1027_s13 }
 0x261   : > { %p13_p4 = scmp.ge.s32.totalorder %s16_s19, 6   ;;  %s1393_s13 = smov %s1031_s14 }
 0x262   : > { %s1394_s14 = smov %s1144_s5  ;;  %s1395_s15 = smov %s1043_s17 }
 0x263   : > { %s1396_s16 = smov %s1047_s18  ;;  %s1397_s17 = smov %s1400_s21 }
 0x264   : > { %s1398_s18 = smov %s1404_s22  ;;  %15 = sbr.rel (!%p13_p4) target bundleno = 5 (0x5), region = 84 }
 0x269   :  { %761 = vsyncpa [#allocation5], 1 }
 0x26a   :  { %763 = vsyncpa [#allocation5 + $0x1], 1 }

</bundles_post_ra>
